<compile_context>
chip_gen: v7x
topology: tpu7x:2x2x1
jax: 0.10.0
libtpu: 0.0.40
codegen_flags: <defaults>
</compile_context>

<pallas_src>
import functools
import numpy as np

import jax
import jax.numpy as jnp
from jax.experimental import pallas as pl
from jax.experimental.pallas import tpu as pltpu

LANE = 128


# ----------------------------------------------------------------------------
# Kernel 1: per-pixel softmax prob of the target class + per-pixel CE loss.
#   logits_ref : (C, TS, 128) f32
#   tgt_ref    : (TS, 128)    int32
#   out_ref    : (2, TS, 128) f32   [0]=prob (+inf if ignored), [1]=CE loss
# ----------------------------------------------------------------------------
def _softmax_ce_kernel(logits_ref, tgt_ref, out_ref, *, ignore_index):
    logits = logits_ref[...].astype(jnp.float32)            # (C, TS, 128)
    tgt = tgt_ref[...]                                       # (TS, 128) int32

    # Class reductions are over the leading axis -> elementwise across slabs.
    m = jnp.max(logits, axis=0)                              # (TS, 128)
    e_sum = jnp.sum(jnp.exp(logits - m[None]), axis=0)       # (TS, 128)

    tgt_safe = jnp.where(tgt == ignore_index, 0, tgt)        # ignore -> class 0
    cls = jax.lax.broadcasted_iota(jnp.int32, logits.shape, 0)
    onehot = (cls == tgt_safe[None]).astype(jnp.float32)     # (C, TS, 128)
    logit_t = jnp.sum(onehot * logits, axis=0)               # (TS, 128)

    log_s = jnp.log(e_sum)
    ce = log_s + m - logit_t                                  # -log softmax[target]
    # Exact division (not approx reciprocal) so threshold comparisons stay
    # bit-consistent with the probability used for the k-th-smallest selection.
    p_t = jnp.exp(logit_t - m) / e_sum                        # (TS, 128)

    valid = tgt != ignore_index
    out_ref[0, :, :] = jnp.where(valid, p_t, jnp.float32(jnp.inf))
    out_ref[1, :, :] = jnp.where(valid, ce, jnp.float32(0.0))


# ----------------------------------------------------------------------------
# Kernel 2: thresholded masked reduction (sum of selected losses, count).
#   thr_ref : (1,) f32 scalar in SMEM
#   pl_ref  : (2, TS, 128) f32   [0]=prob (+inf if invalid), [1]=loss
#   sum_ref, cnt_ref : (1, 1) resident accumulators across the grid.
# ----------------------------------------------------------------------------
def _select_reduce_kernel(thr_ref, pl_ref, sum_ref, cnt_ref):
    @pl.when(pl.program_id(0) == 0)
    def _():
        sum_ref[...] = jnp.zeros_like(sum_ref)
        cnt_ref[...] = jnp.zeros_like(cnt_ref)

    thr = thr_ref[0]                                          # scalar from SMEM
    prob = pl_ref[0, :, :]                                    # (TS, 128)
    loss = pl_ref[1, :, :]                                    # (TS, 128)
    sel = prob < thr                                          # +inf never selected
    sum_ref[...] = sum_ref[...] + jnp.sum(jnp.where(sel, loss, 0.0))
    cnt_ref[...] = cnt_ref[...] + jnp.sum(sel.astype(jnp.float32))


# ----------------------------------------------------------------------------
# Python wrapper reproducing abCE_loss
# ----------------------------------------------------------------------------
class ABCELossPallas:
    def __init__(self, iters_per_epoch, epochs, num_classes, weight=None,
                 reduction='mean', thresh=0.7, min_kept=1, ramp_type='log_rampup'):
        assert weight is None  # TODO(synk): per-class CE weights not exercised (module default is None)
        self.reduction = reduction
        self.thresh = thresh
        self.min_kept = min_kept
        self.ramp_type = ramp_type
        if ramp_type is not None:
            self.iters_per_epoch = iters_per_epoch
            self.num_classes = num_classes
            self.start = 1.0 / num_classes
            self.end = 0.9
            self.total_num_iters = (epochs - 0.6 * epochs) * iters_per_epoch

    @staticmethod
    def _log_rampup(current, rampup_length):
        # utils/ramps.py::log_rampup
        if rampup_length == 0:
            return 1.0
        current = np.clip(current, 0.0, rampup_length)
        return float(1.0 - np.exp(-5.0 * current / rampup_length))

    def threshold(self, curr_iter, epoch):
        cur_total_iter = self.iters_per_epoch * epoch + curr_iter
        current_rampup = self._log_rampup(cur_total_iter, self.total_num_iters)
        return current_rampup * (self.end - self.start) + self.start

    @staticmethod
    def _pick_tile_rows(C, R_raw):
        """Rows-of-128-lanes per tile, sized so double-buffered logits stay
        well inside scoped VMEM on all of v5e/v6e/v7x (<= ~8 MiB for the
        logits input alone; outputs add 2*TS*128*4*2 more)."""
        vmem_budget = 8 * 1024 * 1024                     # logits, double-buffered
        ts_cap = max(8, vmem_budget // (C * LANE * 4 * 2))
        ts = min(512, ts_cap, -(-R_raw // 8) * 8)         # no bigger than padded R
        ts = max(8, (ts // 8) * 8)                        # multiple of 8 sublanes
        return ts

    def forward(self, predict, target, ignore_index, curr_iter, epoch):
        N, C, H, W = predict.shape
        P = N * H * W
        batch_kept = self.min_kept * N

        # ---- tiling / padding (ragged P supported: pad with ignore_index) ----
        R_raw = -(-P // LANE)                             # rows of 128 lanes
        TS = self._pick_tile_rows(C, R_raw)               # rows per grid step
        R = -(-R_raw // TS) * TS                          # padded row count
        P_pad = R * LANE

        # layout glue: NCHW -> (C, P) -> pad -> (C, R, 128); targets -> (R, 128)
        logits2d = jnp.transpose(predict, (1, 0, 2, 3)).reshape(C, P).astype(jnp.float32)
        logits3d = jnp.pad(logits2d, ((0, 0), (0, P_pad - P))).reshape(C, R, LANE)
        tgt_flat = jnp.pad(target.reshape(P).astype(jnp.int32), (0, P_pad - P),
                           constant_values=int(ignore_index))
        tgt2d = tgt_flat.reshape(R, LANE)

        # ---- Kernel 1: softmax / target prob / CE (dense merged output) ----
        pl_out = pl.pallas_call(
            functools.partial(_softmax_ce_kernel, ignore_index=int(ignore_index)),
            out_shape=jax.ShapeDtypeStruct((2, R, LANE), jnp.float32),
            grid=(R // TS,),
            in_specs=[pl.BlockSpec((C, TS, LANE), lambda i: (0, i, 0)),
                      pl.BlockSpec((TS, LANE), lambda i: (i, 0))],
            out_specs=pl.BlockSpec((2, TS, LANE), lambda i: (0, i, 0)),
            compiler_params=pltpu.CompilerParams(dimension_semantics=("parallel",)),
        )(logits3d, tgt2d)

        # ---- glue: annealed threshold + k-th smallest valid prob ----
        if self.ramp_type is not None:
            thresh_val = self.threshold(curr_iter=curr_iter, epoch=epoch)
        else:
            thresh_val = self.thresh

        prob_flat = pl_out[0].reshape(-1)                 # +inf for ignored/padded
        finite = jnp.isfinite(prob_flat)
        numel = jnp.sum(finite.astype(jnp.int32))
        k = min(batch_kept + 1, P_pad)
        neg_top, _ = jax.lax.top_k(-prob_flat, k)         # k smallest valid probs
        smallest = -neg_top                               # ascending
        idx = jnp.clip(jnp.minimum(batch_kept, numel - 1), 0, k - 1)
        min_threshold = jnp.where(numel > 0, smallest[idx], jnp.float32(0.0))
        threshold = jnp.maximum(min_threshold, jnp.float32(thresh_val))
        thr_arr = threshold.reshape(1).astype(jnp.float32)

        # ---- Kernel 2: thresholded masked reduction over large 2D blocks ----
        # TODO(synk): on v7x this could be split 2-way "parallel" with a tiny
        # JAX reduce of the partials; the grid here is already only R//TS steps.
        loss_sum, loss_cnt = pl.pallas_call(
            _select_reduce_kernel,
            out_shape=(jax.ShapeDtypeStruct((1, 1), jnp.float32),
                       jax.ShapeDtypeStruct((1, 1), jnp.float32)),
            grid=(R // TS,),
            in_specs=[pl.BlockSpec(memory_space=pltpu.MemorySpace.SMEM),
                      pl.BlockSpec((2, TS, LANE), lambda i: (0, i, 0))],
            out_specs=(pl.BlockSpec((1, 1), lambda i: (0, 0)),
                       pl.BlockSpec((1, 1), lambda i: (0, 0))),
            compiler_params=pltpu.CompilerParams(dimension_semantics=("arbitrary",)),
        )(thr_arr, pl_out)

        s = loss_sum[0, 0]
        c = loss_cnt[0, 0]
        if self.reduction == 'sum':
            return s
        elif self.reduction == 'mean':
            # mean over selected; empty selection -> sum() == 0 (torch path)
            return jnp.where(c > 0, s / jnp.maximum(c, 1.0), jnp.float32(0.0))
        else:
            raise NotImplementedError('Reduction Error!')


# ----------------------------------------------------------------------------
# Pure numpy reference (mirrors the PyTorch semantics) for validation.
# ----------------------------------------------------------------------------
def reference_abce(predict, target, ignore_index, min_kept, reduction, thresh_value):
    predict = np.asarray(predict, np.float64)
    target = np.asarray(target)
    N, C, H, W = predict.shape
    batch_kept = min_kept * N
    m = predict.max(axis=1, keepdims=True)
    e = np.exp(predict - m)
    prob_out = e / e.sum(axis=1, keepdims=True)
    tmp = np.where(target == ignore_index, 0, target)
    prob = np.take_along_axis(prob_out, tmp[:, None], axis=1)[:, 0]
    mask = target.reshape(-1) != ignore_index
    prob_flat = prob.reshape(-1)
    sort_prob = np.sort(prob_flat[mask])
    if sort_prob.size > 0:
        min_threshold = sort_prob[min(batch_kept, sort_prob.size - 1)]
    else:
        min_threshold = 0.0
    threshold = max(min_threshold, thresh_value)
    logsumexp = np.log(e.sum(axis=1, keepdims=True)) + m
    ce = (logsumexp[:, 0] - np.take_along_axis(predict, tmp[:, None], axis=1)[:, 0]).reshape(-1)
    sel = mask & (prob_flat < threshold)
    selected = ce[sel]
    if reduction == 'sum' or selected.size == 0:
        return float(selected.sum())
    return float(selected.mean())


if __name__ == "__main__":
    # small shapes consistent with the module's semantic segmentation use case
    N, C, H, W = 2, 4, 16, 16
    ignore_index = 255
    key = jax.random.PRNGKey(0)
    k1, k2, k3 = jax.random.split(key, 3)

    predict = jax.random.normal(k1, (N, C, H, W), dtype=jnp.float32)
    target = jax.random.randint(k2, (N, H, W), 0, C, dtype=jnp.int32)
    ignore_mask = jax.random.uniform(k3, (N, H, W)) < 0.1
    target = jnp.where(ignore_mask, ignore_index, target)

    loss_mod = ABCELossPallas(iters_per_epoch=10, epochs=50, num_classes=C,
                              weight=None, reduction='mean', thresh=0.7,
                              min_kept=1, ramp_type='log_rampup')

    out = loss_mod.forward(predict, target, ignore_index=ignore_index,
                           curr_iter=3, epoch=5)
    out = jax.block_until_ready(out)

    ref = reference_abce(np.asarray(predict), np.asarray(target), ignore_index,
                         min_kept=1, reduction='mean',
                         thresh_value=loss_mod.threshold(curr_iter=3, epoch=5))

    if not np.allclose(float(out), ref, rtol=1e-4, atol=1e-5):
        raise AssertionError(f"mismatch: pallas={float(out)} ref={ref}")

    print("KERNEL_OK")
</pallas_src>

<mosaic_0001>
module attributes {stable_mosaic.version = 11 : i64} {
  func.func @_softmax_ce_kernel(%arg0: i32, %arg1: memref<4x8x128xf32, #tpu.memory_space<vmem>>, %arg2: memref<8x128xi32, #tpu.memory_space<vmem>>, %arg3: memref<2x8x128xf32, #tpu.memory_space<vmem>>) attributes {dimension_semantics = [#tpu.dimension_semantics<parallel>], iteration_bounds = array<i64: 1>, scalar_prefetch = 0 : i64, scratch_operands = 0 : i64, tpu.core_type = #tpu.core_type<tc>, window_params = [{transform_indices = @transform_0, window_bounds = array<i64: 4, 8, 128>}, {transform_indices = @transform_1, window_bounds = array<i64: 8, 128>}, {transform_indices = @transform_2, window_bounds = array<i64: 2, 8, 128>}]} {
    %c0 = arith.constant 0 : index
    %c0_0 = arith.constant 0 : index
    %c0_1 = arith.constant 0 : index
    %0 = vector.load %arg1[%c0, %c0_0, %c0_1] : memref<4x8x128xf32, #tpu.memory_space<vmem>>, vector<4x8x128xf32>
    %c0_2 = arith.constant 0 : index
    %c0_3 = arith.constant 0 : index
    %1 = vector.load %arg2[%c0_2, %c0_3] : memref<8x128xi32, #tpu.memory_space<vmem>>, vector<8x128xi32>
    %cst = arith.constant dense<0xFF800000> : vector<8x128xf32>
    %2 = vector.multi_reduction <maximumf>, %0, %cst [0] : vector<4x8x128xf32> to vector<8x128xf32>
    %3 = vector.shape_cast %2 : vector<8x128xf32> to vector<1x8x128xf32>
    %4 = vector.broadcast %3 : vector<1x8x128xf32> to vector<4x8x128xf32>
    %5 = arith.subf %0, %4 : vector<4x8x128xf32>
    %6 = math.exp %5 : vector<4x8x128xf32>
    %cst_4 = arith.constant dense<0.000000e+00> : vector<8x128xf32>
    %7 = vector.multi_reduction <add>, %6, %cst_4 [0] : vector<4x8x128xf32> to vector<8x128xf32>
    %c255_i32 = arith.constant 255 : i32
    %8 = vector.broadcast %c255_i32 : i32 to vector<8x128xi32>
    %9 = arith.cmpi eq, %1, %8 : vector<8x128xi32>
    %c0_i32 = arith.constant 0 : i32
    %10 = vector.broadcast %c0_i32 : i32 to vector<8x128xi32>
    %11 = arith.select %9, %10, %1 : vector<8x128xi1>, vector<8x128xi32>
    %12 = tpu.iota {dimensions = array<i32: 0>} : vector<4x8x128xi32>
    %13 = vector.shape_cast %11 : vector<8x128xi32> to vector<1x8x128xi32>
    %14 = vector.broadcast %13 : vector<1x8x128xi32> to vector<4x8x128xi32>
    %15 = arith.cmpi eq, %12, %14 : vector<4x8x128xi32>
    %16 = arith.extui %15 : vector<4x8x128xi1> to vector<4x8x128xi32>
    %17 = arith.sitofp %16 : vector<4x8x128xi32> to vector<4x8x128xf32>
    %18 = arith.mulf %17, %0 : vector<4x8x128xf32>
    %cst_5 = arith.constant dense<0.000000e+00> : vector<8x128xf32>
    %19 = vector.multi_reduction <add>, %18, %cst_5 [0] : vector<4x8x128xf32> to vector<8x128xf32>
    %20 = math.log %7 : vector<8x128xf32>
    %21 = arith.addf %20, %2 : vector<8x128xf32>
    %22 = arith.subf %21, %19 : vector<8x128xf32>
    %23 = arith.subf %19, %2 : vector<8x128xf32>
    %24 = math.exp %23 : vector<8x128xf32>
    %25 = arith.divf %24, %7 : vector<8x128xf32>
    %c255_i32_6 = arith.constant 255 : i32
    %26 = vector.broadcast %c255_i32_6 : i32 to vector<8x128xi32>
    %27 = arith.cmpi ne, %1, %26 : vector<8x128xi32>
    %cst_7 = arith.constant 0x7F800000 : f32
    %28 = vector.broadcast %cst_7 : f32 to vector<8x128xf32>
    %29 = arith.select %27, %25, %28 : vector<8x128xi1>, vector<8x128xf32>
    %c0_8 = arith.constant 0 : index
    %c0_9 = arith.constant 0 : index
    %c0_10 = arith.constant 0 : index
    %30 = vector.load %arg3[%c0_8, %c0_9, %c0_10] : memref<2x8x128xf32, #tpu.memory_space<vmem>>, vector<1x8x128xf32>
    %31 = vector.shape_cast %30 : vector<1x8x128xf32> to vector<8x128xf32>
    %32 = vector.shape_cast %29 : vector<8x128xf32> to vector<1x8x128xf32>
    tpu.vector_store %arg3[%c0_8, %c0_9, %c0_10], %32 {strides = array<i32>} : memref<2x8x128xf32, #tpu.memory_space<vmem>>, vector<1x8x128xf32>,
    %cst_11 = arith.constant 0.000000e+00 : f32
    %33 = vector.broadcast %cst_11 : f32 to vector<8x128xf32>
    %34 = arith.select %27, %22, %33 : vector<8x128xi1>, vector<8x128xf32>
    %c1 = arith.constant 1 : index
    %c0_12 = arith.constant 0 : index
    %c0_13 = arith.constant 0 : index
    %35 = vector.load %arg3[%c1, %c0_12, %c0_13] : memref<2x8x128xf32, #tpu.memory_space<vmem>>, vector<1x8x128xf32>
    %36 = vector.shape_cast %35 : vector<1x8x128xf32> to vector<8x128xf32>
    %37 = vector.shape_cast %34 : vector<8x128xf32> to vector<1x8x128xf32>
    tpu.vector_store %arg3[%c1, %c0_12, %c0_13], %37 {strides = array<i32>} : memref<2x8x128xf32, #tpu.memory_space<vmem>>, vector<1x8x128xf32>,
    return
  }
  func.func @transform_0(%arg0: i32) -> (i32, i32, i32) {
    %c0_i32 = arith.constant 0 : i32
    %c0_i32_0 = arith.constant 0 : i32
    %c0_i32_1 = arith.constant 0 : i32
    return %c0_i32, %arg0, %c0_i32_0 : i32, i32, i32
  }
  func.func @transform_1(%arg0: i32) -> (i32, i32) {
    %c0_i32 = arith.constant 0 : i32
    %c0_i32_0 = arith.constant 0 : i32
    return %arg0, %c0_i32 : i32, i32
  }
  func.func @transform_2(%arg0: i32) -> (i32, i32, i32) {
    %c0_i32 = arith.constant 0 : i32
    %c0_i32_0 = arith.constant 0 : i32
    %c0_i32_1 = arith.constant 0 : i32
    return %c0_i32, %arg0, %c0_i32_0 : i32, i32, i32
  }
}

</mosaic_0001>

<bundles_post_ra>
// kernel: tpu_custom_call.1
= control target key start
LH: loop header
LB: loop body
LE: loop exit
PB: predicated region body
PF: predicated region fallthrough
CT: control target
= control target key end

     0   :  { %7 = vsyncpa [#allocation3], 0  ;;  %s274_s0 = inlined_call_operand.hbm [shape: f32[4,8,128], index: 0, kind: input, shape index: {}]   ;;  %s275_s1 = inlined_call_operand.hbm [shape: s32[8,128], index: 1, kind: input, shape index: {}]   ;;  %s276_s2 = inlined_call_operand.hbm [shape: f32[2,8,128], index: 2, kind: output, shape index: {}]  }
   0x1   :  { %8 = vsyncpa [#allocation6], 0 }
   0x2   :  { %9 = vsyncpa [#allocation4], 0  ;;  %s211_s9 = smov [#allocation2]   ;;  %s139_s13 = scalar_lea.hbm %s274_s0, 512 }
   0x3   :  { %s15_s10 = sshll.u32 %s211_s9, 4  ;;  %p140_p0 = scmp.ne.s32.totalorder %s274_s0, %s139_s13  ;;  %s16_s10 = int_to_ptr.vmem [resolvable:$true] %s15_s10 }
   0x4   :  { %p143_p1 = scmp.lt.u32.totalorder %s139_s13, %s274_s0 }
   0x6   :  { %p145_p2 = pnand %p143_p1, %p140_p0 }
   0x8   :  { %148 = shalt.err (!%p145_p2)
}
   0x9   :  { %s149_s18 = scalar_lea.vmem %s16_s10, 512  ;;  %p154_p4 = scmp.lt.s32.totalorder %s16_s10, %s16_s10 }
   0xa   :  { %p150_p3 = scmp.ne.s32.totalorder %s16_s10, %s149_s18  ;;  %p155_p5 = scmp.lt.s32.totalorder %s149_s18, %s149_s18 }
   0xc   :  { %p156_p6 = por %p155_p5, %p154_p4 }
   0xe   :  { %p157_p7 = pnand %p156_p6, %p150_p3 }
  0x10   :  { %160 = shalt.err (!%p157_p7)
}
  0x11   :  { %s212_s19 = smov 128   ;;  %s213_s20 = smov 8  }
  0x12   :  { %21 = dma.hbm_to_vmem [thread:$0]  %s274_s0, 512, %s16_s10, [#allocation3], %s212_s19, %s212_s19, %s213_s20  }
  0x13   :  { %s214_s23 = smov [#allocation5]   ;;  %s161_s27 = scalar_lea.hbm %s275_s1, 128 }
  0x14   :  { %s28_s24 = sshll.u32 %s214_s23, 4  ;;  %p162_p8 = scmp.ne.s32.totalorder %s275_s1, %s161_s27  ;;  %s29_s24 = int_to_ptr.vmem [resolvable:$true] %s28_s24 }
  0x15   :  { %p165_p9 = scmp.lt.u32.totalorder %s161_s27, %s275_s1 }
  0x17   :  { %p167_p10 = pnand %p165_p9, %p162_p8 }
  0x19   :  { %170 = shalt.err (!%p167_p10)
}
  0x1a   :  { %s171_s4 = scalar_lea.vmem %s29_s24, 128  ;;  %p176_p12 = scmp.lt.s32.totalorder %s29_s24, %s29_s24 }
  0x1b   :  { %p172_p11 = scmp.ne.s32.totalorder %s29_s24, %s171_s4  ;;  %p177_p13 = scmp.lt.s32.totalorder %s171_s4, %s171_s4 }
  0x1d   :  { %p178_p0 = por %p177_p13, %p176_p12 }
  0x1f   :  { %p179_p1 = pnand %p178_p0, %p172_p11 }
  0x21   :  { %182 = shalt.err (!%p179_p1)
}
  0x22   :  { %31 = dma.hbm_to_vmem [thread:$0]  %s275_s1, 128, %s29_s24, [#allocation6]  }
  0x23   :  { %205 = dma.done.wait [#allocation3], 512  }
  0x24   :  { %206 = vsyncadd [#allocation3], 4294966784 }
  0x25   :  { %207 = dma.done.wait [#allocation6], 128  }
  0x26   :  { %208 = vsyncadd [#allocation6], 4294967168  ;;  %v38_v0 = vld [vmem:[#allocation2] sm:$0xff]  ;;  %v39_v1 = vld [vmem:[#allocation2 + $0x8] sm:$0xff]  ;;  %v215_v9 = vmov 0.0   ;;  %s216_s1 = smov [#allocation7]  }
  0x27   :  { %v40_v2 = vld [vmem:[#allocation2 + $0x10] sm:$0xff]  ;;  %v41_v3 = vld [vmem:[#allocation2 + $0x18] sm:$0xff]  ;;  %v42_v4 = vld [vmem:[#allocation5] sm:$0xff]  ;;  %v43_v5 = vmax.f32 %v38_v0, %v39_v1  ;;  %s102_s6 = sshll.u32 %s216_s1, 4  ;;  %s103_s6 = int_to_ptr.vmem [resolvable:$true] %s102_s6 }
  0x28   :  { %v44_v6 = vmax.f32 %v40_v2, %v41_v3  ;;  %vm61_vm0 = vcmp.eq.s32.totalorder %v42_v4, 255  ;;  %vm91_vm5 = vcmp.ne.s32.totalorder %v42_v4, 255  ;;  %s183_s7 = scalar_lea.vmem %s103_s6, 256  ;;  %p188_p3 = scmp.lt.s32.totalorder %s103_s6, %s103_s6 }
  0x29   :  { %v62_v7 = vsel %vm61_vm0, 0, %v42_v4  ;;  %p184_p2 = scmp.ne.s32.totalorder %s103_s6, %s183_s7  ;;  %p189_p4 = scmp.lt.s32.totalorder %s183_s7, %s183_s7 }
  0x2a   :  { %v45_v8 = vmax.f32 %v43_v5, %v44_v6  ;;  %vm63_vm1 = vcmp.eq.s32.totalorder %v62_v7, 0  ;;  %vm64_vm2 = vcmp.eq.s32.totalorder %v62_v7, 1  ;;  %vm65_vm3 = vcmp.eq.s32.totalorder %v62_v7, 2 }
  0x2b   :  { %vm66_vm4 = vcmp.eq.s32.totalorder %v62_v7, 3  ;;  %v115_v10 = vsel %vm63_vm1, 1.0, %v215_v9  ;;  %v116_v11 = vsel %vm64_vm2, 1.0, %v215_v9  ;;  %v117_v12 = vsel %vm65_vm3, 1.0, %v215_v9  ;;  %p190_p5 = por %p189_p4, %p188_p3 }
  0x2c   :  { %v46_v13 = vsub.f32 %v38_v0, %v45_v8  ;;  %v47_v14 = vsub.f32 %v39_v1, %v45_v8  ;;  %v48_v15 = vsub.f32 %v40_v2, %v45_v8  ;;  %v49_v16 = vsub.f32 %v41_v3, %v45_v8 }
  0x2d   :  { %v118_v17 = vsel %vm66_vm4, 1.0, %v215_v9  ;;  %v75_v18 = vmul.f32 %v115_v10, %v38_v0  ;;  %v76_v19 = vmul.f32 %v116_v11, %v39_v1  ;;  %v77_v20 = vmul.f32 %v117_v12, %v40_v2  ;;  %p191_p6 = pnand %p190_p5, %p184_p2 }
  0x2e   :  { %v50_v21 = vmul.f32 1.442695, %v46_v13  ;;  %v52_v22 = vmul.f32 1.442695, %v47_v14  ;;  %v54_v23 = vmul.f32 1.442695, %v48_v15  ;;  %v78_v26 = vmul.f32 %v118_v17, %v41_v3 }
  0x2f   :  { %v56_v24 = vmul.f32 1.442695, %v49_v16  ;;  %v79_v25 = vadd.f32 %v76_v19, %v75_v18 }
  0x30   :  { %125 = vpow2.f32 %v50_v21 }
  0x31   :  { %127 = vpow2.f32 %v52_v22  ;;  %v80_v27 = vadd.f32 %v79_v25, %v77_v20 }
  0x32   :  { %129 = vpow2.f32 %v54_v23 }
  0x33   :  { %131 = vpow2.f32 %v56_v24  ;;  %v81_v28 = vadd.f32 %v80_v27, %v78_v26 }
  0x35   :  { %v86_v29 = vsub.f32 %v81_v28, %v45_v8 }
  0x37   :  { %v87_v34 = vmul.f32 1.442695, %v86_v29 }
  0x39   :  { %133 = vpow2.f32 %v87_v34 }
  0x3a   :  { %v126_v30 = vpop.eup %125 }
  0x3b   :  { %v128_v31 = vpop.eup %127 }
  0x3c   :  { %v130_v32 = vpop.eup %129  ;;  %v58_v33 = vadd.f32 %v128_v31, %v126_v30 }
  0x3d   :  { %v132_v35 = vpop.eup %131 }
  0x3e   :  { %v59_v36 = vadd.f32 %v130_v32, %v58_v33 }
  0x40   :  { %v60_v37 = vadd.f32 %v132_v35, %v59_v36 }
  0x42   :  { %135 = vrcp.f32 %v60_v37 }
  0x43   :  { %137 = vlog2.f32 %v60_v37  ;;  %v134_v38 = vpop.eup %133 }
  0x4c   :  { %v136_v39 = vpop.eup %135 }
  0x4d   :  { %v138_v40 = vpop.eup %137  ;;  %v90_v41 = vmul.f32 %v136_v39, %v134_v38 }
  0x4e   :  { %v83_v42 = vmul.f32 0.6931472, %v138_v40 }
  0x4f   :  { %v92_v43 = vsel %vm91_vm5, %v90_v41, inf }
  0x50   :  { %93 = vst [vmem:[#allocation7] sm:$0xff] %v92_v43  ;;  %v84_v44 = vadd.f32 %v83_v42, %v45_v8 }
  0x52   :  { %v85_v45 = vsub.f32 %v84_v44, %v81_v28 }
  0x54   :  { %v94_v46 = vsel %vm91_vm5, %v85_v45, 0.0 }
  0x55   :  { %96 = vst [vmem:[#allocation7 + $0x8] sm:$0xff] %v94_v46 }
  0x56   :  { %194 = shalt.err (!%p191_p6)
}
  0x57   :  { %s195_s10 = scalar_lea.hbm %s276_s2, 256 }
  0x58   :  { %p196_p7 = scmp.ne.s32.totalorder %s276_s2, %s195_s10  ;;  %p199_p8 = scmp.lt.u32.totalorder %s195_s10, %s276_s2 }
  0x5a   :  { %p201_p9 = pnand %p199_p8, %p196_p7 }
  0x5c   :  { %204 = shalt.err (!%p201_p9)
}
  0x5d   :  { %108 = dma.vmem_to_hbm [thread:$0]  %s103_s6, 256, %s276_s2, [#allocation4], %s212_s19, %s212_s19, %s213_s20  }
  0x5e   :  { %209 = dma.done.wait [#allocation4], 256  }
  0x5f   :  { %210 = vsyncadd [#allocation4], 4294967040 }
  0x60   :  { %112 = vsyncpa [#allocation3], 1 }
  0x61   :  { %113 = vsyncpa [#allocation6], 1 }
  0x62   :  { %114 = vsyncpa [#allocation4], 1 }

</bundles_post_ra>
